<compile_context>
chip_gen: v6e
topology: v6e:2x2x1
jax: 0.10.0
libtpu: 0.0.40
codegen_flags: <defaults>
</compile_context>

<pallas_src>
import jax
import jax.numpy as jnp
from jax import lax
from jax.experimental import pallas as pl
from jax.experimental.pallas import tpu as pltpu


def _flat_decoder_kernel(emb_ref, w_ref, b_ref, out_ref):
    # emb_ref: [N, E]      (same block every step -> stays resident)
    # w_ref:   [Ts*V, E]   (native nn.Linear [out_features, in_features] rows)
    # b_ref:   [Ts, V]
    # out_ref: [Ts, N]     (seq-major output block)
    n = emb_ref.shape[0]
    ts, v = b_ref.shape

    # emb @ W.T : contract E against the RHS's last dim, so the weight slab is
    # consumed in its native layout (no transpose anywhere).
    logits = lax.dot_general(
        emb_ref[...], w_ref[...],
        dimension_numbers=(((1,), (1,)), ((), ())),
        preferred_element_type=jnp.float32,
    )                                                        # [N, Ts*V] f32
    logits = logits.reshape(n, ts, v) + b_ref[...][None, :, :]   # [N, Ts, V]
    idx = jnp.argmax(logits, axis=-1).astype(jnp.int32)          # [N, Ts]
    out_ref[...] = idx.T                                         # [Ts, N]


def _choose_ts(s, v, e, itemsize, max_slab_bytes):
    """Pick how many seq positions to process per grid step.

    The per-buffer weight slab is Ts*V*E*itemsize; keep it under
    `max_slab_bytes` so the double-buffered pipeline fits comfortably in the
    scoped VMEM limit on every TPU generation.
    """
    per_pos = v * e * itemsize
    if s * per_pos <= max_slab_bytes:
        return s  # tiny-problem fast path: single grid step
    divisors = [d for d in range(1, s + 1)
                if s % d == 0 and d * per_pos <= max_slab_bytes]
    if not divisors:
        # TODO(synk): V-tiled online argmax (running max/argmax carried in VMEM
        # scratch over an inner 'arbitrary' V grid axis) for vocabularies where
        # even a single seq position's [V, E] slab exceeds the VMEM budget.
        return 1
    mult8 = [d for d in divisors if d % 8 == 0]
    return max(mult8) if mult8 else max(divisors)


def flat_decoder_forward(embedding, weight, bias, out_seq_len, vocab_size,
                         *, compute_dtype=None,
                         max_slab_bytes=8 * 1024 * 1024):
    """embedding: [N, E]
       weight:    [V*S, E]  (PyTorch nn.Linear layout: [out_features, in])
       bias:      [V*S]
       returns utterances: [S, N] int32 (argmax over vocab, eval mode)."""
    n, e = embedding.shape
    s, v = out_seq_len, vocab_size
    assert weight.shape == (s * v, e), weight.shape
    assert bias.shape == (s * v,), bias.shape

    if compute_dtype is not None:
        # Cast the streamed tensors once, outside the hot loop; accumulation
        # stays f32 inside the kernel. Bias is added post-matmul in f32.
        embedding = embedding.astype(compute_dtype)
        weight = weight.astype(compute_dtype)

    itemsize = jnp.dtype(weight.dtype).itemsize
    ts = _choose_ts(s, v, e, itemsize, max_slab_bytes)
    num_blocks = s // ts

    bias_sv = bias.reshape(s, v)  # contiguous, free reshape (no relayout)

    grid_spec = pltpu.PrefetchScalarGridSpec(
        num_scalar_prefetch=0,
        grid=(num_blocks,),
        in_specs=[
            # embedding: same block every step (resident / reused)
            pl.BlockSpec((n, e), lambda i: (0, 0)),
            # weight rows for seq positions [i*Ts, (i+1)*Ts), native layout
            pl.BlockSpec((ts * v, e), lambda i: (i, 0)),
            # matching bias rows
            pl.BlockSpec((ts, v), lambda i: (i, 0)),
        ],
        # sublane-dense (Ts, N) output block (Ts % 8 == 0 or Ts == S)
        out_specs=pl.BlockSpec((ts, n), lambda i: (i, 0)),
    )

    return pl.pallas_call(
        _flat_decoder_kernel,
        out_shape=jax.ShapeDtypeStruct((s, n), jnp.int32),
        grid_spec=grid_spec,
        compiler_params=pltpu.CompilerParams(
            # parallel seq-block axis: lets v7x's two TensorCores split the
            # work; neutral on v5e/v6e.
            dimension_semantics=("parallel",),
            # explicit scoped-VMEM limit (v5e default is only 16 MiB); slab
            # sizing above keeps total usage well under this on v7x too.
            vmem_limit_bytes=32 * 1024 * 1024,
        ),
    )(embedding, weight, bias_sv)


def flat_decoder_ref(embedding, weight, bias, out_seq_len, vocab_size):
    """Pure-JAX reference mirroring the PyTorch eval-mode forward."""
    n = embedding.shape[0]
    relations = embedding @ weight.T + bias                # [N, S*V]
    relations = relations.reshape(n, out_seq_len, vocab_size)
    relations = jnp.transpose(relations, (1, 0, 2))        # [S, N, V]
    return jnp.argmax(relations, axis=-1).astype(jnp.int32)


if __name__ == "__main__":
    # Small shapes consistent with FlatDecoder(embedding_size, out_seq_len, vocab_size)
    N, E, S, V = 2, 32, 8, 16

    key = jax.random.PRNGKey(0)
    k_emb, k_w, k_b = jax.random.split(key, 3)

    embedding = jax.random.normal(k_emb, (N, E), dtype=jnp.float32)
    # Deterministic "Linear" params, PyTorch layout: weight [out, in], bias [out]
    weight = jax.random.normal(k_w, (V * S, E), dtype=jnp.float32) * 0.1
    bias = jax.random.normal(k_b, (V * S,), dtype=jnp.float32) * 0.1

    # f32 path (bit-exact against the pure-JAX reference).
    utterances = flat_decoder_forward(embedding, weight, bias, S, V)
    utterances = jax.block_until_ready(utterances)

    ref = flat_decoder_ref(embedding, weight, bias, S, V)
    assert utterances.shape == (S, N), utterances.shape
    assert utterances.dtype == jnp.int32
    assert jnp.array_equal(utterances, ref), (utterances, ref)

    # bf16 fast path: halves weight HBM traffic, f32 accumulation on the MXU.
    # (argmax is tie-break sensitive, so only shape/dtype are asserted here.)
    utterances_bf16 = flat_decoder_forward(
        embedding, weight, bias, S, V, compute_dtype=jnp.bfloat16)
    utterances_bf16 = jax.block_until_ready(utterances_bf16)
    assert utterances_bf16.shape == (S, N)
    assert utterances_bf16.dtype == jnp.int32

    print("KERNEL_OK")
</pallas_src>

<mosaic_0001>
module attributes {stable_mosaic.version = 11 : i64} {
  func.func @_flat_decoder_kernel(%arg0: i32, %arg1: memref<2x32xf32, #tpu.memory_space<vmem>>, %arg2: memref<128x32xf32, #tpu.memory_space<vmem>>, %arg3: memref<8x16xf32, #tpu.memory_space<vmem>>, %arg4: memref<8x2xi32, #tpu.memory_space<vmem>>) attributes {dimension_semantics = [#tpu.dimension_semantics<parallel>], iteration_bounds = array<i64: 1>, scalar_prefetch = 0 : i64, scratch_operands = 0 : i64, tpu.core_type = #tpu.core_type<tc>, window_params = [{pipeline_mode = #tpu.pipeline_mode<synchronous>, transform_indices = @transform_0, window_bounds = array<i64: 2, 32>}, {transform_indices = @transform_1, window_bounds = array<i64: 128, 32>}, {transform_indices = @transform_2, window_bounds = array<i64: 8, 16>}, {transform_indices = @transform_3, window_bounds = array<i64: 8, 2>}]} {
    %c0 = arith.constant 0 : index
    %c0_0 = arith.constant 0 : index
    %0 = vector.load %arg1[%c0, %c0_0] : memref<2x32xf32, #tpu.memory_space<vmem>>, vector<2x32xf32>
    %c0_1 = arith.constant 0 : index
    %c0_2 = arith.constant 0 : index
    %1 = vector.load %arg2[%c0_1, %c0_2] : memref<128x32xf32, #tpu.memory_space<vmem>>, vector<128x32xf32>
    %cst = arith.constant dense<0.000000e+00> : vector<2x128xf32>
    %2 = tpu.matmul %0, %1, %cst {dimension_numbers = #tpu.dot_dimension_numbers<[1], [1], [0], [0], [0, 0, 1, 0], [], []>} : vector<2x32xf32>, vector<128x32xf32>, vector<2x128xf32> -> vector<2x128xf32>
    %3 = vector.shape_cast %2 : vector<2x128xf32> to vector<2x8x16xf32>
    %c0_3 = arith.constant 0 : index
    %c0_4 = arith.constant 0 : index
    %4 = vector.load %arg3[%c0_3, %c0_4] : memref<8x16xf32, #tpu.memory_space<vmem>>, vector<8x16xf32>
    %5 = vector.shape_cast %4 : vector<8x16xf32> to vector<1x8x16xf32>
    %6 = vector.broadcast %5 : vector<1x8x16xf32> to vector<2x8x16xf32>
    %7 = arith.addf %3, %6 : vector<2x8x16xf32>
    %8 = tpu.reduce_index %7 {axis = 2 : i32, kind = #tpu.reduction_kind<arg_max>} : vector<2x8x16xf32> -> vector<2x8xi32>
    %9 = tpu.transpose %8, [1, 0] : vector<2x8xi32> -> vector<8x2xi32>
    %c0_5 = arith.constant 0 : index
    %c0_6 = arith.constant 0 : index
    %10 = vector.load %arg4[%c0_5, %c0_6] : memref<8x2xi32, #tpu.memory_space<vmem>>, vector<8x2xi32>
    tpu.vector_store %arg4[%c0_5, %c0_6], %9 {strides = array<i32>} : memref<8x2xi32, #tpu.memory_space<vmem>>, vector<8x2xi32>,
    return
  }
  func.func @transform_0(%arg0: i32) -> (i32, i32) {
    %c0_i32 = arith.constant 0 : i32
    %c0_i32_0 = arith.constant 0 : i32
    %c0_i32_1 = arith.constant 0 : i32
    return %c0_i32, %c0_i32_0 : i32, i32
  }
  func.func @transform_1(%arg0: i32) -> (i32, i32) {
    %c0_i32 = arith.constant 0 : i32
    %c0_i32_0 = arith.constant 0 : i32
    return %arg0, %c0_i32 : i32, i32
  }
  func.func @transform_2(%arg0: i32) -> (i32, i32) {
    %c0_i32 = arith.constant 0 : i32
    %c0_i32_0 = arith.constant 0 : i32
    return %arg0, %c0_i32 : i32, i32
  }
  func.func @transform_3(%arg0: i32) -> (i32, i32) {
    %c0_i32 = arith.constant 0 : i32
    %c0_i32_0 = arith.constant 0 : i32
    return %arg0, %c0_i32 : i32, i32
  }
}

</mosaic_0001>

<bundles_post_ra>
// kernel: tpu_custom_call.1
= control target key start
LH: loop header
LB: loop body
LE: loop exit
PB: predicated region body
PF: predicated region fallthrough
CT: control target
= control target key end

     0   :  { %vm31_vm0 = vcmask 261120   ;;  %v366_v0 = vmov 0.0   ;;  %vm367_vm1 = vmmov 0   ;;  %s368_s19 = smov 80   ;;  %s369_s20 = smov 112   ;;  %v179_v20 = vlaneseq  ;;  %s471_s1 = inlined_call_operand.vmem [shape: f32[128,32], index: 1, kind: input, shape index: {}]   ;;  %s472_s0 = inlined_call_operand.vmem [shape: f32[2,32], index: 0, kind: input, shape index: {}]   ;;  %s473_s2 = inlined_call_operand.vmem [shape: f32[8,16], index: 2, kind: input, shape index: {}]   ;;  %s474_s3 = inlined_call_operand.vmem [shape: s32[8,2], index: 3, kind: output, shape index: {}]  }
   0x1   :  { %319 = vmatprep.subr.mxu0 %v366_v0  ;;  %v30_v1 = vld [vmem:[%s471_s1 + $0x78] sm:$0xff]  ;;  %351 = vmatprep.mubr.msk.f32.mxu0 %vm367_vm1, %v366_v0  ;;  %v29_v2 = vld [vmem:[%s471_s1 + $0x70] sm:$0xff]  ;;  %v28_v3 = vld [vmem:[%s471_s1 + $0x68] sm:$0xff]  ;;  %s370_s21 = smov 64   ;;  %s371_s22 = smov 96   ;;  %vm228_vm2 = vcmask 130048  }
   0x2   :  { %320 = vmatpush3.xpose.msk.msra.mxu0 %vm31_vm0, %v30_v1  ;;  %v27_v4 = vld [vmem:[%s471_s1 + $0x60] sm:$0xff]  ;;  %v26_v5 = vld [vmem:[%s471_s1 + $0x58] sm:$0xff]  ;;  %v25_v6 = vld [vmem:[%s471_s1 + $0x50] sm:$0xff]  ;;  %s372_s23 = smov 32   ;;  %s374_s24 = smov 16   ;;  %v180_v21 = vshrl.u32 %v179_v20, 7 }
   0x3   :  { %321 = vmatprep.subr.mxu0 %v366_v0  ;;  %v24_v7 = vld [vmem:[%s471_s1 + $0x48] sm:$0xff]  ;;  %v23_v8 = vld [vmem:[%s471_s1 + $0x40] sm:$0xff]  ;;  %v22_v9 = vld [vmem:[%s471_s1 + $0x38] sm:$0xff]  ;;  %v236_v22 = vand.u32 127, %v179_v20  ;;  %v375_v26 = vmov 1983009808  }
   0x4   :  { %v21_v10 = vld [vmem:[%s471_s1 + $0x30] sm:$0xff]  ;;  %v20_v11 = vld [vmem:[%s471_s1 + $0x28] sm:$0xff]  ;;  %v19_v12 = vld [vmem:[%s471_s1 + $0x20] sm:$0xff]  ;;  %v177_v27 = vunpack.c.l.s4 %v375_v26  ;;  %v376_v32 = vmov 1934713408   ;;  %vm245_vm3 = vcmask 1041409  }
   0x5   :  { %v18_v13 = vld [vmem:[%s471_s1 + $0x18] sm:$0xff]  ;;  %v17_v14 = vld [vmem:[%s471_s1 + $0x10] sm:$0xff]  ;;  %v16_v15 = vld [vmem:[%s471_s1 + $0x8] sm:$0xff]  ;;  %v239_v23 = vsub.s32 %v236_v22, %v180_v21  ;;  %v209_v33 = vunpack.c.l.s4 %v376_v32  ;;  %vm279_vm4 = vcmask 15360  }
   0x6   :  { %322 = vmatpush3.xpose.msk.msra.mxu0 %vm31_vm0, %v29_v2  ;;  %v15_v16 = vld [vmem:[%s471_s1] sm:$0xff]  ;;  %s373_s1 = smov 48   ;;  %v178_v30 = vunpack.c.0.s8 %v177_v27 }
   0x7   :  { %323 = vmatprep.subr.mxu0 %v366_v0  ;;  %v14_v17 = vld [vmem:[%s472_s0] sm:$0x3]  ;;  %v210_v40 = vunpack.c.0.s8 %v209_v33 }
   0x8   :  { %v181_v36 = vsub.s32 %v178_v30, %v180_v21  ;;  %v225_v51 = vld [vmem:[%s473_s2] sm:$0xff] }
   0x9   :  { %v213_v47 = vsub.s32 %v210_v40, %v180_v21 }
   0xa   :  { %324 = vmatpush3.xpose.msk.msra.mxu0 %vm31_vm0, %v28_v3 }
   0xb   :  { %325 = vmatprep.subr.mxu0 %v366_v0 }
   0xe   :  { %326 = vmatpush3.xpose.msk.msra.mxu0 %vm31_vm0, %v27_v4 }
   0xf   :  { %327 = vmatprep.subr.mxu0 %v366_v0 }
  0x12   :  { %328 = vmatpush3.xpose.msk.msra.mxu0 %vm31_vm0, %v26_v5 }
  0x13   :  { %329 = vmatprep.subr.mxu0 %v366_v0 }
  0x16   :  { %330 = vmatpush3.xpose.msk.msra.mxu0 %vm31_vm0, %v25_v6 }
  0x17   :  { %331 = vmatprep.subr.mxu0 %v366_v0 }
  0x1a   :  { %332 = vmatpush3.xpose.msk.msra.mxu0 %vm31_vm0, %v24_v7 }
  0x1b   :  { %333 = vmatprep.subr.mxu0 %v366_v0 }
  0x1e   :  { %334 = vmatpush3.xpose.msk.msra.mxu0 %vm31_vm0, %v23_v8 }
  0x1f   :  { %335 = vmatprep.subr.mxu0 %v366_v0 }
  0x22   :  { %336 = vmatpush3.xpose.msk.msra.mxu0 %vm31_vm0, %v22_v9 }
  0x23   :  { %337 = vmatprep.subr.mxu0 %v366_v0 }
  0x26   :  { %338 = vmatpush3.xpose.msk.msra.mxu0 %vm31_vm0, %v21_v10 }
  0x27   :  { %339 = vmatprep.subr.mxu0 %v366_v0 }
  0x2a   :  { %340 = vmatpush3.xpose.msk.msra.mxu0 %vm31_vm0, %v20_v11 }
  0x2b   :  { %341 = vmatprep.subr.mxu0 %v366_v0 }
  0x2e   :  { %342 = vmatpush3.xpose.msk.msra.mxu0 %vm31_vm0, %v19_v12 }
  0x2f   :  { %343 = vmatprep.subr.mxu0 %v366_v0 }
  0x32   :  { %344 = vmatpush3.xpose.msk.msra.mxu0 %vm31_vm0, %v18_v13 }
  0x33   :  { %345 = vmatprep.subr.mxu0 %v366_v0 }
  0x36   :  { %346 = vmatpush3.xpose.msk.msra.mxu0 %vm31_vm0, %v17_v14 }
  0x37   :  { %347 = vmatprep.subr.mxu0 %v366_v0 }
  0x3a   :  { %348 = vmatpush3.xpose.msk.msra.mxu0 %vm31_vm0, %v16_v15 }
  0x3b   :  { %349 = vmatprep.subr.mxu0 %v366_v0 }
  0x3e   :  { %350 = vmatpush3.xpose.msk.msra.mxu0 %vm31_vm0, %v15_v16 }
  0x41   :  { %352 = vmatmul.mubr.msk.f32.vlgmr.msra.gmra.mxu0 %vm31_vm0, %v14_v17 }
 0x101   :  { %v149_v18 = vpop.f32.mrf.mxu0 }
 0x102   :  { %160 = vrot.lane.b32.xlu1 %v149_v18, %s368_s19  ;;  %154 = vrot.lane.b32.xlu0 %v149_v18, %s369_s20 }
 0x103   :  { %v353_v19 = vpop.f32.mrf.mxu0 }
 0x106   :  { %163 = vrot.lane.b32.xlu1 %v149_v18, %s370_s21  ;;  %157 = vrot.lane.b32.xlu0 %v149_v18, %s371_s22 }
 0x10a   :  { %169 = vrot.lane.b32.xlu1 %v149_v18, %s372_s23  ;;  %166 = vrot.lane.b32.xlu0 %v149_v18, %s373_s1 }
 0x10e   :  { %172 = vrot.lane.b32.xlu0 %v149_v18, %s374_s24 }
 0x174   :  { %v161_v24 = vpop.permute.xlu1 %160  ;;  %v155_v25 = vpop.permute.xlu0 %154 }
 0x175   :  { %v183_v37 = vcombine.low %v155_v25, %v161_v24 }
 0x177   :  { %v190_v42 = vrot.slane %v183_v37, %v181_v36 }
 0x178   :  { %v164_v28 = vpop.permute.xlu1 %163  ;;  %v158_v29 = vpop.permute.xlu0 %157 }
 0x179   :  { %v175_v31 = vcombine.low %v149_v18, %v158_v29 }
 0x17b   :  { %v182_v38 = vrot.slane %v175_v31, %v181_v36 }
 0x17c   :  { %v170_v34 = vpop.permute.xlu1 %169  ;;  %v167_v35 = vpop.permute.xlu0 %166 }
 0x17d   :  { %v191_v39 = vcombine.low %v164_v28, %v170_v34  ;;  %v207_v44 = vcombine.low %v182_v38, %v190_v42 }
 0x17f   :  { %v198_v45 = vrot.slane %v191_v39, %v181_v36  ;;  %v214_v49 = vrot.slane %v207_v44, %v213_v47 }
 0x180   :  { %v173_v41 = vpop.permute.xlu0 %172 }
 0x181   :  { %v199_v43 = vcombine.low %v167_v35, %v173_v41 }
 0x183   :  { %v206_v46 = vrot.slane %v199_v43, %v181_v36 }
 0x185   :  { %v215_v48 = vcombine.low %v198_v45, %v206_v46 }
 0x187   :  { %v222_v50 = vrot.slane %v215_v48, %v213_v47 }
 0x189   :  { %v224_v52 = vcombine.high %v214_v49, %v222_v50  ;;  %v223_v53 = vcombine.low %v214_v49, %v222_v50 }
 0x18b   :  { %v227_v54 = vadd.f32 %v225_v51, %v224_v52  ;;  %v226_v55 = vadd.f32 %v225_v51, %v223_v53 }
 0x18d   :  { %v232_v56 = vsel %vm228_vm2, %v227_v54, -inf  ;;  %v229_v57 = vsel %vm228_vm2, %v226_v55, -inf }
 0x18e   :  { %233 = vmax.index.xlane.f32.xlu0 %v232_v56  ;;  %230 = vmax.index.xlane.f32.xlu1 %v229_v57 }
 0x217   :  { %v234_v58 = vpop.xlane.xlu0 %233  ;;  %v231_v59 = vpop.xlane.xlu1 %230 }
 0x218   :  { %v244_v60 = vrot.slane %v234_v58, %v239_v23  ;;  %v240_v61 = vrot.slane %v231_v59, %v239_v23 }
 0x21a   :  { %v246_v62 = vsel %vm245_vm3, %v244_v60, %v240_v61 }
 0x21b   :  { %247 = vxpose.xlu0.b32.start.end [1/1] (short) (narrow) %v246_v62, 8 }
 0x297   :  { %v263_v63 = vpop.trf.xlu0 }
 0x298   :  { %280 = vst.msk [vmem:[%s474_s3] sm:$0xff] %vm279_vm4, %v263_v63 }

</bundles_post_ra>
